<compile_context>
chip_gen: v5e
topology: v5e:2x2
jax: 0.10.0
libtpu: 0.0.40
codegen_flags: <defaults>
</compile_context>

<pallas_src>
import math
import functools

import jax
import jax.numpy as jnp
from jax.experimental import pallas as pl
from jax.experimental.pallas import tpu as pltpu


# ----------------------------------------------------------------------------
# Fused Pallas kernel: full GAT forward (all heads + out_att) in one call.
# ----------------------------------------------------------------------------
def _gat_fused_kernel(x_ref, mask_ref, w1_ref, a1_ref, w2_ref, a2_ref, out_ref,
                      *, nheads, f_out):
    x = x_ref[...]            # (N, F_in)          bf16
    mask = mask_ref[...]      # (N, N)             f32  (adj > 0), shared by all heads
    W1 = w1_ref[...]          # (F_in, H*F_out)    bf16 (heads stacked column-wise)
    A1 = a1_ref[...]          # (H*F_out, 2*H)     bf16 (block-diag [a1_h | a2_h])
    W2 = w2_ref[...]          # (H*F_out, F_out)   bf16
    A2 = a2_ref[...]          # (F_out, 2)         bf16

    N = x.shape[0]

    # ---- layer 1: all heads' Wh in one wide MXU matmul (f32 accumulate) -----
    Wh_all = jnp.dot(x, W1, preferred_element_type=jnp.float32)    # (N, H*F_out) f32
    Wh_all_bf = Wh_all.astype(jnp.bfloat16)
    # All heads' (Wh@a1, Wh@a2) columns in one MXU matmul (replaces VPU mul + XLU sums).
    WhA = jnp.dot(Wh_all_bf, A1, preferred_element_type=jnp.float32)  # (N, 2H) f32

    def _attention(wh1, wh2, wh_bf):
        # e[i, j] = relu(wh1[i] + wh2[j])  (the module's "leakyrelu" is nn.ReLU()).
        e = jnp.maximum(wh1 + wh2.T, 0.0)                           # (N, N) f32
        # Masked softmax over rows. e >= 0 and self-loops guarantee a valid max,
        # so exp(e - rowmax)*mask matches where(adj>0, e, -9e15) + softmax.
        row_max = jnp.max(e * mask, axis=1, keepdims=True)          # (N, 1)
        p = jnp.exp(e - row_max) * mask                             # (N, N)
        inv = pl.reciprocal(jnp.sum(p, axis=1, keepdims=True), approx=True)
        att = (p * inv).astype(jnp.bfloat16)                        # (N, N) bf16
        # attention @ Wh   (bf16 operands, f32 accumulate)
        return jnp.dot(att, wh_bf, preferred_element_type=jnp.float32)

    def _elu(v):
        # ELU (alpha=1): x if x>0 else exp(x)-1 (clamp exp arg in unselected branch).
        return jnp.where(v > 0.0, v, jnp.exp(jnp.minimum(v, 0.0)) - 1.0)

    # ---- layer-2 Wh accumulated in-kernel (== concat(heads) @ W2) -----------
    wh2_acc = jnp.zeros((N, f_out), jnp.float32)
    for hd in range(nheads):                      # nheads is static -> unrolled
        wh_h = Wh_all_bf[:, hd * f_out:(hd + 1) * f_out]            # (N, F_out) bf16
        hp = _attention(WhA[:, 2 * hd:2 * hd + 1],
                        WhA[:, 2 * hd + 1:2 * hd + 2],
                        wh_h)                                       # (N, F_out) f32
        hp = _elu(hp)                             # concat=True heads -> ELU
        wh2_acc = wh2_acc + jnp.dot(
            hp.astype(jnp.bfloat16),
            W2[hd * f_out:(hd + 1) * f_out, :],
            preferred_element_type=jnp.float32)

    # ---- layer 2 (out_att, concat=False) + GAT's final F.elu -----------------
    Wh2_bf = wh2_acc.astype(jnp.bfloat16)
    WhA2 = jnp.dot(Wh2_bf, A2, preferred_element_type=jnp.float32)  # (N, 2) f32
    out = _attention(WhA2[:, 0:1], WhA2[:, 1:2], Wh2_bf)            # (N, F_out) f32
    out_ref[...] = _elu(out)


# ----------------------------------------------------------------------------
# Wrapper: stack parameters, build the shared adjacency mask, one pallas_call.
# ----------------------------------------------------------------------------
def gat_forward(params, x, adj):
    N, _ = x.shape
    nheads = len(params["attentions"])
    f_out = params["attentions"][0]["W"].shape[1]

    # Per-head weights stacked column-wise -> one wide h@W matmul.
    W1 = jnp.concatenate([p["W"] for p in params["attentions"]], axis=1)   # (Fin, H*Fo)

    # Block-diagonal attention-vector matrix: Wh_all @ A1 -> all heads' wh1/wh2 columns.
    A1 = jnp.zeros((nheads * f_out, 2 * nheads), jnp.float32)
    for hd, p in enumerate(params["attentions"]):
        a = p["a"][:, 0]
        A1 = A1.at[hd * f_out:(hd + 1) * f_out, 2 * hd].set(a[:f_out])
        A1 = A1.at[hd * f_out:(hd + 1) * f_out, 2 * hd + 1].set(a[f_out:])

    W2 = params["out_att"]["W"]                                            # (H*Fo, Fo)
    a2v = params["out_att"]["a"][:, 0]
    A2 = jnp.stack([a2v[:f_out], a2v[f_out:]], axis=1)                     # (Fo, 2)

    # Adjacency mask computed once, shared by all heads and both layers.
    mask = (adj > 0).astype(jnp.float32)

    kernel = functools.partial(_gat_fused_kernel, nheads=nheads, f_out=f_out)
    vmem = pl.BlockSpec(memory_space=pltpu.MemorySpace.VMEM)
    return pl.pallas_call(
        kernel,
        out_shape=jax.ShapeDtypeStruct((N, f_out), jnp.float32),
        in_specs=[vmem] * 6,
        out_specs=vmem,
    )(x.astype(jnp.bfloat16), mask,
      W1.astype(jnp.bfloat16), A1.astype(jnp.bfloat16),
      W2.astype(jnp.bfloat16), A2.astype(jnp.bfloat16))


# ----------------------------------------------------------------------------
# Parameter init (xavier_uniform with gain=1.414, deterministic).
# ----------------------------------------------------------------------------
def _xavier_uniform(key, shape, gain=1.414):
    fan_in, fan_out = shape[0], shape[1]
    bound = gain * math.sqrt(6.0 / (fan_in + fan_out))
    return jax.random.uniform(key, shape, jnp.float32, -bound, bound)


def init_gat_params(key, in_feature, out_feature, nheads):
    params = {"attentions": [], "out_att": None}
    for _ in range(nheads):
        key, k1, k2 = jax.random.split(key, 3)
        params["attentions"].append({
            "W": _xavier_uniform(k1, (in_feature, out_feature)),
            "a": _xavier_uniform(k2, (2 * out_feature, 1)),
        })
    key, k1, k2 = jax.random.split(key, 3)
    params["out_att"] = {
        "W": _xavier_uniform(k1, (out_feature * nheads, out_feature)),
        "a": _xavier_uniform(k2, (2 * out_feature, 1)),
    }
    return params


# ----------------------------------------------------------------------------
# main
# ----------------------------------------------------------------------------
if __name__ == "__main__":
    N = 8              # number of graph nodes
    in_feature = 16
    out_feature = 32
    nheads = 2
    dropout = 0.6      # unused (inference)

    key = jax.random.PRNGKey(0)
    key, kx, kadj, kparam = jax.random.split(key, 4)

    x = jax.random.normal(kx, (N, in_feature), dtype=jnp.float32)

    # Random symmetric binary adjacency with self-loops.
    rand = jax.random.uniform(kadj, (N, N))
    adj = (rand + rand.T > 1.0).astype(jnp.float32)
    adj = jnp.maximum(adj, jnp.eye(N, dtype=jnp.float32))

    params = init_gat_params(kparam, in_feature, out_feature, nheads)

    out = jax.block_until_ready(gat_forward(params, x, adj))
    assert out.shape == (N, out_feature)
    assert bool(jnp.all(jnp.isfinite(out)))
    print("KERNEL_OK")
</pallas_src>

<mosaic_0001>
module attributes {stable_mosaic.version = 11 : i64} {
  func.func @_gat_fused_kernel(%arg0: memref<8x16xbf16, #tpu.memory_space<vmem>>, %arg1: memref<8x8xf32, #tpu.memory_space<vmem>>, %arg2: memref<16x64xbf16, #tpu.memory_space<vmem>>, %arg3: memref<64x4xbf16, #tpu.memory_space<vmem>>, %arg4: memref<64x32xbf16, #tpu.memory_space<vmem>>, %arg5: memref<32x2xbf16, #tpu.memory_space<vmem>>, %arg6: memref<8x32xf32, #tpu.memory_space<vmem>>) attributes {dimension_semantics = [], scalar_prefetch = 0 : i64, scratch_operands = 0 : i64, tpu.core_type = #tpu.core_type<tc>} {
    %c0 = arith.constant 0 : index
    %c0_0 = arith.constant 0 : index
    %0 = vector.load %arg0[%c0, %c0_0] : memref<8x16xbf16, #tpu.memory_space<vmem>>, vector<8x16xbf16>
    %c0_1 = arith.constant 0 : index
    %c0_2 = arith.constant 0 : index
    %1 = vector.load %arg1[%c0_1, %c0_2] : memref<8x8xf32, #tpu.memory_space<vmem>>, vector<8x8xf32>
    %c0_3 = arith.constant 0 : index
    %c0_4 = arith.constant 0 : index
    %2 = vector.load %arg2[%c0_3, %c0_4] : memref<16x64xbf16, #tpu.memory_space<vmem>>, vector<16x64xbf16>
    %c0_5 = arith.constant 0 : index
    %c0_6 = arith.constant 0 : index
    %3 = vector.load %arg3[%c0_5, %c0_6] : memref<64x4xbf16, #tpu.memory_space<vmem>>, vector<64x4xbf16>
    %c0_7 = arith.constant 0 : index
    %c0_8 = arith.constant 0 : index
    %4 = vector.load %arg4[%c0_7, %c0_8] : memref<64x32xbf16, #tpu.memory_space<vmem>>, vector<64x32xbf16>
    %c0_9 = arith.constant 0 : index
    %c0_10 = arith.constant 0 : index
    %5 = vector.load %arg5[%c0_9, %c0_10] : memref<32x2xbf16, #tpu.memory_space<vmem>>, vector<32x2xbf16>
    %cst = arith.constant dense<0.000000e+00> : vector<8x64xf32>
    %6 = tpu.matmul %0, %2, %cst {dimension_numbers = #tpu.dot_dimension_numbers<[1], [0], [0], [1], [0, 0, 1, 1], [], []>} : vector<8x16xbf16>, vector<16x64xbf16>, vector<8x64xf32> -> vector<8x64xf32>
    %7 = arith.truncf %6 : vector<8x64xf32> to vector<8x64xbf16>
    %cst_11 = arith.constant dense<0.000000e+00> : vector<8x4xf32>
    %8 = tpu.matmul %7, %3, %cst_11 {dimension_numbers = #tpu.dot_dimension_numbers<[1], [0], [0], [1], [0, 0, 1, 1], [], []>} : vector<8x64xbf16>, vector<64x4xbf16>, vector<8x4xf32> -> vector<8x4xf32>
    %cst_12 = arith.constant 0.000000e+00 : f32
    %9 = vector.broadcast %cst_12 : f32 to vector<8x32xf32>
    %10 = vector.extract_strided_slice %7 {offsets = [0, 0], sizes = [8, 32], strides = [1, 1]} : vector<8x64xbf16> to vector<8x32xbf16>
    %11 = vector.extract_strided_slice %8 {offsets = [0, 0], sizes = [8, 1], strides = [1, 1]} : vector<8x4xf32> to vector<8x1xf32>
    %12 = vector.extract_strided_slice %8 {offsets = [0, 1], sizes = [8, 1], strides = [1, 1]} : vector<8x4xf32> to vector<8x1xf32>
    %13 = tpu.transpose %12, [1, 0] : vector<8x1xf32> -> vector<1x8xf32>
    %14 = vector.broadcast %11 : vector<8x1xf32> to vector<8x8xf32>
    %15 = vector.broadcast %13 : vector<1x8xf32> to vector<8x8xf32>
    %16 = arith.addf %14, %15 : vector<8x8xf32>
    %cst_13 = arith.constant 0.000000e+00 : f32
    %17 = vector.broadcast %cst_13 : f32 to vector<8x8xf32>
    %18 = arith.maximumf %16, %17 : vector<8x8xf32>
    %19 = arith.mulf %18, %1 : vector<8x8xf32>
    %cst_14 = arith.constant dense<0xFF800000> : vector<8xf32>
    %20 = vector.multi_reduction <maximumf>, %19, %cst_14 [1] : vector<8x8xf32> to vector<8xf32>
    %21 = vector.shape_cast %20 : vector<8xf32> to vector<8x1xf32>
    %22 = vector.broadcast %21 : vector<8x1xf32> to vector<8x8xf32>
    %23 = arith.subf %18, %22 : vector<8x8xf32>
    %24 = math.exp %23 : vector<8x8xf32>
    %25 = arith.mulf %24, %1 : vector<8x8xf32>
    %cst_15 = arith.constant dense<0.000000e+00> : vector<8xf32>
    %26 = vector.multi_reduction <add>, %25, %cst_15 [1] : vector<8x8xf32> to vector<8xf32>
    %27 = vector.shape_cast %26 : vector<8xf32> to vector<8x1xf32>
    %28 = tpu.reciprocal %27 {approx = true} : vector<8x1xf32> -> vector<8x1xf32>
    %29 = vector.broadcast %28 : vector<8x1xf32> to vector<8x8xf32>
    %30 = arith.mulf %25, %29 : vector<8x8xf32>
    %31 = arith.truncf %30 : vector<8x8xf32> to vector<8x8xbf16>
    %cst_16 = arith.constant dense<0.000000e+00> : vector<8x32xf32>
    %32 = tpu.matmul %31, %10, %cst_16 {dimension_numbers = #tpu.dot_dimension_numbers<[1], [0], [0], [1], [0, 0, 1, 1], [], []>} : vector<8x8xbf16>, vector<8x32xbf16>, vector<8x32xf32> -> vector<8x32xf32>
    %cst_17 = arith.constant 0.000000e+00 : f32
    %33 = vector.broadcast %cst_17 : f32 to vector<8x32xf32>
    %34 = arith.cmpf ogt, %32, %33 : vector<8x32xf32>
    %cst_18 = arith.constant 0.000000e+00 : f32
    %35 = vector.broadcast %cst_18 : f32 to vector<8x32xf32>
    %36 = arith.minimumf %32, %35 : vector<8x32xf32>
    %37 = math.exp %36 : vector<8x32xf32>
    %cst_19 = arith.constant 1.000000e+00 : f32
    %38 = vector.broadcast %cst_19 : f32 to vector<8x32xf32>
    %39 = arith.subf %37, %38 : vector<8x32xf32>
    %40 = arith.select %34, %32, %39 : vector<8x32xi1>, vector<8x32xf32>
    %41 = arith.truncf %40 : vector<8x32xf32> to vector<8x32xbf16>
    %42 = vector.extract_strided_slice %4 {offsets = [0, 0], sizes = [32, 32], strides = [1, 1]} : vector<64x32xbf16> to vector<32x32xbf16>
    %cst_20 = arith.constant dense<0.000000e+00> : vector<8x32xf32>
    %43 = tpu.matmul %41, %42, %cst_20 {dimension_numbers = #tpu.dot_dimension_numbers<[1], [0], [0], [1], [0, 0, 1, 1], [], []>} : vector<8x32xbf16>, vector<32x32xbf16>, vector<8x32xf32> -> vector<8x32xf32>
    %44 = arith.addf %9, %43 : vector<8x32xf32>
    %45 = vector.extract_strided_slice %7 {offsets = [0, 32], sizes = [8, 32], strides = [1, 1]} : vector<8x64xbf16> to vector<8x32xbf16>
    %46 = vector.extract_strided_slice %8 {offsets = [0, 2], sizes = [8, 1], strides = [1, 1]} : vector<8x4xf32> to vector<8x1xf32>
    %47 = vector.extract_strided_slice %8 {offsets = [0, 3], sizes = [8, 1], strides = [1, 1]} : vector<8x4xf32> to vector<8x1xf32>
    %48 = tpu.transpose %47, [1, 0] : vector<8x1xf32> -> vector<1x8xf32>
    %49 = vector.broadcast %46 : vector<8x1xf32> to vector<8x8xf32>
    %50 = vector.broadcast %48 : vector<1x8xf32> to vector<8x8xf32>
    %51 = arith.addf %49, %50 : vector<8x8xf32>
    %cst_21 = arith.constant 0.000000e+00 : f32
    %52 = vector.broadcast %cst_21 : f32 to vector<8x8xf32>
    %53 = arith.maximumf %51, %52 : vector<8x8xf32>
    %54 = arith.mulf %53, %1 : vector<8x8xf32>
    %cst_22 = arith.constant dense<0xFF800000> : vector<8xf32>
    %55 = vector.multi_reduction <maximumf>, %54, %cst_22 [1] : vector<8x8xf32> to vector<8xf32>
    %56 = vector.shape_cast %55 : vector<8xf32> to vector<8x1xf32>
    %57 = vector.broadcast %56 : vector<8x1xf32> to vector<8x8xf32>
    %58 = arith.subf %53, %57 : vector<8x8xf32>
    %59 = math.exp %58 : vector<8x8xf32>
    %60 = arith.mulf %59, %1 : vector<8x8xf32>
    %cst_23 = arith.constant dense<0.000000e+00> : vector<8xf32>
    %61 = vector.multi_reduction <add>, %60, %cst_23 [1] : vector<8x8xf32> to vector<8xf32>
    %62 = vector.shape_cast %61 : vector<8xf32> to vector<8x1xf32>
    %63 = tpu.reciprocal %62 {approx = true} : vector<8x1xf32> -> vector<8x1xf32>
    %64 = vector.broadcast %63 : vector<8x1xf32> to vector<8x8xf32>
    %65 = arith.mulf %60, %64 : vector<8x8xf32>
    %66 = arith.truncf %65 : vector<8x8xf32> to vector<8x8xbf16>
    %cst_24 = arith.constant dense<0.000000e+00> : vector<8x32xf32>
    %67 = tpu.matmul %66, %45, %cst_24 {dimension_numbers = #tpu.dot_dimension_numbers<[1], [0], [0], [1], [0, 0, 1, 1], [], []>} : vector<8x8xbf16>, vector<8x32xbf16>, vector<8x32xf32> -> vector<8x32xf32>
    %cst_25 = arith.constant 0.000000e+00 : f32
    %68 = vector.broadcast %cst_25 : f32 to vector<8x32xf32>
    %69 = arith.cmpf ogt, %67, %68 : vector<8x32xf32>
    %cst_26 = arith.constant 0.000000e+00 : f32
    %70 = vector.broadcast %cst_26 : f32 to vector<8x32xf32>
    %71 = arith.minimumf %67, %70 : vector<8x32xf32>
    %72 = math.exp %71 : vector<8x32xf32>
    %cst_27 = arith.constant 1.000000e+00 : f32
    %73 = vector.broadcast %cst_27 : f32 to vector<8x32xf32>
    %74 = arith.subf %72, %73 : vector<8x32xf32>
    %75 = arith.select %69, %67, %74 : vector<8x32xi1>, vector<8x32xf32>
    %76 = arith.truncf %75 : vector<8x32xf32> to vector<8x32xbf16>
    %77 = vector.extract_strided_slice %4 {offsets = [32, 0], sizes = [32, 32], strides = [1, 1]} : vector<64x32xbf16> to vector<32x32xbf16>
    %cst_28 = arith.constant dense<0.000000e+00> : vector<8x32xf32>
    %78 = tpu.matmul %76, %77, %cst_28 {dimension_numbers = #tpu.dot_dimension_numbers<[1], [0], [0], [1], [0, 0, 1, 1], [], []>} : vector<8x32xbf16>, vector<32x32xbf16>, vector<8x32xf32> -> vector<8x32xf32>
    %79 = arith.addf %44, %78 : vector<8x32xf32>
    %80 = arith.truncf %79 : vector<8x32xf32> to vector<8x32xbf16>
    %cst_29 = arith.constant dense<0.000000e+00> : vector<8x2xf32>
    %81 = tpu.matmul %80, %5, %cst_29 {dimension_numbers = #tpu.dot_dimension_numbers<[1], [0], [0], [1], [0, 0, 1, 1], [], []>} : vector<8x32xbf16>, vector<32x2xbf16>, vector<8x2xf32> -> vector<8x2xf32>
    %82 = vector.extract_strided_slice %81 {offsets = [0, 0], sizes = [8, 1], strides = [1, 1]} : vector<8x2xf32> to vector<8x1xf32>
    %83 = vector.extract_strided_slice %81 {offsets = [0, 1], sizes = [8, 1], strides = [1, 1]} : vector<8x2xf32> to vector<8x1xf32>
    %84 = tpu.transpose %83, [1, 0] : vector<8x1xf32> -> vector<1x8xf32>
    %85 = vector.broadcast %82 : vector<8x1xf32> to vector<8x8xf32>
    %86 = vector.broadcast %84 : vector<1x8xf32> to vector<8x8xf32>
    %87 = arith.addf %85, %86 : vector<8x8xf32>
    %cst_30 = arith.constant 0.000000e+00 : f32
    %88 = vector.broadcast %cst_30 : f32 to vector<8x8xf32>
    %89 = arith.maximumf %87, %88 : vector<8x8xf32>
    %90 = arith.mulf %89, %1 : vector<8x8xf32>
    %cst_31 = arith.constant dense<0xFF800000> : vector<8xf32>
    %91 = vector.multi_reduction <maximumf>, %90, %cst_31 [1] : vector<8x8xf32> to vector<8xf32>
    %92 = vector.shape_cast %91 : vector<8xf32> to vector<8x1xf32>
    %93 = vector.broadcast %92 : vector<8x1xf32> to vector<8x8xf32>
    %94 = arith.subf %89, %93 : vector<8x8xf32>
    %95 = math.exp %94 : vector<8x8xf32>
    %96 = arith.mulf %95, %1 : vector<8x8xf32>
    %cst_32 = arith.constant dense<0.000000e+00> : vector<8xf32>
    %97 = vector.multi_reduction <add>, %96, %cst_32 [1] : vector<8x8xf32> to vector<8xf32>
    %98 = vector.shape_cast %97 : vector<8xf32> to vector<8x1xf32>
    %99 = tpu.reciprocal %98 {approx = true} : vector<8x1xf32> -> vector<8x1xf32>
    %100 = vector.broadcast %99 : vector<8x1xf32> to vector<8x8xf32>
    %101 = arith.mulf %96, %100 : vector<8x8xf32>
    %102 = arith.truncf %101 : vector<8x8xf32> to vector<8x8xbf16>
    %cst_33 = arith.constant dense<0.000000e+00> : vector<8x32xf32>
    %103 = tpu.matmul %102, %80, %cst_33 {dimension_numbers = #tpu.dot_dimension_numbers<[1], [0], [0], [1], [0, 0, 1, 1], [], []>} : vector<8x8xbf16>, vector<8x32xbf16>, vector<8x32xf32> -> vector<8x32xf32>
    %cst_34 = arith.constant 0.000000e+00 : f32
    %104 = vector.broadcast %cst_34 : f32 to vector<8x32xf32>
    %105 = arith.cmpf ogt, %103, %104 : vector<8x32xf32>
    %cst_35 = arith.constant 0.000000e+00 : f32
    %106 = vector.broadcast %cst_35 : f32 to vector<8x32xf32>
    %107 = arith.minimumf %103, %106 : vector<8x32xf32>
    %108 = math.exp %107 : vector<8x32xf32>
    %cst_36 = arith.constant 1.000000e+00 : f32
    %109 = vector.broadcast %cst_36 : f32 to vector<8x32xf32>
    %110 = arith.subf %108, %109 : vector<8x32xf32>
    %111 = arith.select %105, %103, %110 : vector<8x32xi1>, vector<8x32xf32>
    %c0_37 = arith.constant 0 : index
    %c0_38 = arith.constant 0 : index
    %112 = vector.load %arg6[%c0_37, %c0_38] : memref<8x32xf32, #tpu.memory_space<vmem>>, vector<8x32xf32>
    tpu.vector_store %arg6[%c0_37, %c0_38], %111 {strides = array<i32>} : memref<8x32xf32, #tpu.memory_space<vmem>>, vector<8x32xf32>,
    return
  }
}

</mosaic_0001>

<bundles_post_ra>
// kernel: tpu_custom_call.1
= control target key start
LH: loop header
LB: loop body
LE: loop exit
PB: predicated region body
PF: predicated region fallthrough
CT: control target
= control target key end

     0   :  { %s702_s0 = inlined_call_operand.vmem [shape: bf16[8,16], index: 0, kind: input, shape index: {}]   ;;  %s703_s1 = inlined_call_operand.vmem [shape: f32[8,8], index: 1, kind: input, shape index: {}]   ;;  %s704_s2 = inlined_call_operand.vmem [shape: bf16[16,64], index: 2, kind: input, shape index: {}]   ;;  %s705_s3 = inlined_call_operand.vmem [shape: bf16[64,4], index: 3, kind: input, shape index: {}]   ;;  %s706_s4 = inlined_call_operand.vmem [shape: bf16[64,32], index: 4, kind: input, shape index: {}]   ;;  %s707_s5 = inlined_call_operand.vmem [shape: bf16[32,2], index: 5, kind: input, shape index: {}]   ;;  %s708_s6 = inlined_call_operand.hbm [shape: f32[8,32], index: 6, kind: output, shape index: {}]  }
   0x1   :  { %v524_v0 = vld [vmem:[%s704_s2] sm:$0xff]  ;;  %v528_v1 = vld [vmem:[%s705_s3 + $0x18] sm:$0xff] }
   0x2   :  { %11 = vsyncpa [#allocation3], 0  ;;  %66 = vmatpush.bf16.msra.mxu0 %v524_v0  ;;  %v25_v2 = vld [vmem:[%s702_s0] sm:$0xf]  ;;  %vm55_vm0 = vcmask 130048   ;;  %105 = vmatpush.bf16.msra.mxu1 %v528_v1  ;;  %v527_v3 = vld [vmem:[%s705_s3 + $0x10] sm:$0xff] }
   0x3   :  { %v526_v4 = vld [vmem:[%s705_s3 + $0x8] sm:$0xff]  ;;  %v525_v5 = vld [vmem:[%s705_s3] sm:$0xff]  ;;  %v590_v6 = vmov 0   ;;  %vm97_vm1 = vcmask 523264   ;;  %vm175_vm2 = vcmask 1043456   ;;  %s591_s0 = smov 127  }
   0x4   :  { %542 = vset.pattern.permute.xlu1 %v590_v6  ;;  %v592_v13 = vmov 2   ;;  %s593_s3 = smov 125   ;;  %v656_v20 = vld [vmem:[%s703_s1] sm:$0xff]  ;;  %vm158_vm3 = vcmask 64512   ;;  %s594_s1 = smov 96   ;;  %v530_v55 = vld [vmem:[%s706_s4 + $0x8] sm:$0xff] }
   0x5   :  { %473 = vmatmul.msk.bf16.vlgmr.msra.gmra.mxu0 %vm55_vm0, %v25_v2  ;;  %v529_v56 = vld [vmem:[%s706_s4] sm:$0xff]  ;;  %v532_v57 = vld [vmem:[%s706_s4 + $0x18] sm:$0xff]  ;;  %v531_v58 = vld [vmem:[%s706_s4 + $0x10] sm:$0xff]  ;;  %vm297_vm5 = vcmask 261120   ;;  %s595_s4 = smov [#allocation2]   ;;  %s460_s24 = sshll.u32 %s708_s6, 4  ;;  %s461_s24 = int_to_ptr.hbm [resolvable:$true] %s460_s24 }
   0x6   :  { %106 = vmatpush.bf16.msra.mxu1 %v527_v3  ;;  %307 = vmatpush.bf16.msrb.mxu0 %v532_v57  ;;  %v534_v59 = vld [vmem:[%s707_s5 + $0x8] sm:$0xff]  ;;  %v533_v60 = vld [vmem:[%s707_s5] sm:$0xff]  ;;  %s458_s5 = sshll.u32 %s595_s4, 4  ;;  %s459_s5 = int_to_ptr.vmem [resolvable:$true] %s458_s5 }
   0xa   :  { %107 = vmatpush.bf16.msra.mxu1 %v526_v4  ;;  %308 = vmatpush.bf16.msrb.mxu0 %v531_v58 }
   0xe   :  { %108 = vmatpush.bf16.msra.mxu1 %v525_v5 }
  0x82   :  { %v68_v7 = vpop.f32.mrf.mxu0 }
  0x83   :  { %v72_v8 = vpack.c.bf16 %v68_v7, %v68_v7 }
  0x85   :  { %490 = vmatmul.msk.bf16.vlgmr.msra.gmra.mxu1 %vm97_vm1, %v72_v8  ;;  %v176_v9 = vsel %vm175_vm2, %v72_v8, 0  ;;  %v255_v31 = vunpack.c.l.b16 %v72_v8 }
  0x86   :  { %185 = vmatpush.bf16.msra.mxu2 %v176_v9 }
  0x87   :  { %v256_v32 = vpack.c.b16 %v255_v31, %v255_v31 }
  0x8a   :  { %v70_v10 = vpop.f32.mrf.mxu0  ;;  %335 = vmatpush.bf16.msrb.mxu2 %v530_v55 }
  0x8e   :  { %336 = vmatpush.bf16.msrb.mxu2 %v529_v56 }
 0x102   :  { %v110_v11 = vpop.f32.mrf.mxu1 }
 0x103   :  { %151 = vperm.xlu1 %542, %v110_v11   ;;  %115 = vrot.lane.b32.xlu0 %v110_v11, %s591_s0 }
 0x10a   :  { %v112_v12 = vpop.f32.mrf.mxu1 }
 0x10b   :  { %543 = vset.pattern.permute.xlu1 %v592_v13  ;;  %198 = vrot.lane.b32.xlu0 %v110_v11, %s593_s3 }
 0x10c   :  { %234 = vperm.xlu1 %543, %v110_v11  }
 0x114   :  { %544 = vset.pattern.permute.xlu1 %v590_v6 }
 0x175   :  { %v116_v14 = vpop.permute.xlu0 %115  ;;  %v152_v16 = vpop.permute.xlu1 %151 }
 0x176   :  { %118 = vxpose.xlu2.b32.start.end [1/1] (short) (narrow) %v116_v14, 8 }
 0x17d   :  { %v199_v15 = vpop.permute.xlu0 %198 }
 0x17e   :  { %201 = vxpose.xlu2.b32.start.end [1/1] (short) (narrow) %v199_v15, 8  ;;  %v235_v26 = vpop.permute.xlu1 %234 }
 0x20f   :  { %v134_v17 = vpop.trf.xlu2 }
 0x210   :  { %v154_v18 = vperm.slane %v134_v17, 0 }
 0x212   :  { %v155_v19 = vadd.f32 %v154_v18, %v152_v16 }
 0x214   :  { %v156_v21 = vmax.f32 %v155_v19, 0.0 }
 0x216   :  { %v157_v22 = vmul.f32 %v156_v21, %v656_v20 }
 0x217   :  { %v217_v23 = vpop.trf.xlu2 }
 0x218   :  { %v237_v24 = vperm.slane %v217_v23, 0  ;;  %v159_v25 = vsel %vm158_vm3, %v157_v22, -inf }
 0x219   :  { %160 = vmax.xlane.f32.xlu0 %v159_v25 }
 0x21a   :  { %v238_v27 = vadd.f32 %v237_v24, %v235_v26 }
 0x21c   :  { %v239_v28 = vmax.f32 %v238_v27, 0.0 }
 0x21e   :  { %v240_v29 = vmul.f32 %v239_v28, %v656_v20 }
 0x220   :  { %v241_v30 = vsel %vm158_vm3, %v240_v29, -inf }
 0x221   :  { %242 = vmax.xlane.f32.xlu1 %v241_v30 }
 0x23a   :  { %257 = vrot.lane.b32.xlu1 %v256_v32, %s594_s1 }
 0x28c   :  { %v161_v33 = vpop.xlane.xlu0 %160 }
 0x28d   :  { %v162_v34 = vsub.f32 %v156_v21, %v161_v33 }
 0x28f   :  { %v163_v35 = vmul.f32 1.442695, %v162_v34 }
 0x291   :  { %546 = vpow2.f32 %v163_v35 }
 0x294   :  { %v243_v36 = vpop.xlane.xlu1 %242 }
 0x295   :  { %v244_v37 = vsub.f32 %v239_v28, %v243_v36 }
 0x297   :  { %v547_v38 = vpop.eup %546  ;;  %v245_v39 = vmul.f32 1.442695, %v244_v37 }
 0x298   :  { %v165_v40 = vmul.f32 %v547_v38, %v656_v20 }
 0x299   :  { %548 = vpow2.f32 %v245_v39 }
 0x29a   :  { %v166_v41 = vsel %vm158_vm3, %v165_v40, 0.0 }
 0x29b   :  { %167 = vadd.xlane.f32.xlu2 %v166_v41 }
 0x29f   :  { %v549_v42 = vpop.eup %548 }
 0x2a0   :  { %v247_v43 = vmul.f32 %v549_v42, %v656_v20 }
 0x2a2   :  { %v248_v44 = vsel %vm158_vm3, %v247_v43, 0.0 }
 0x2a3   :  { %249 = vadd.xlane.f32.xlu0 %v248_v44 }
 0x2ac   :  { %v258_v45 = vpop.permute.xlu1 %257 }
 0x2ad   :  { %v263_v46 = vsel %vm175_vm2, %v258_v45, 0 }
 0x2ae   :  { %272 = vmatpush.bf16.msra.mxu3 %v263_v46 }
 0x2b2   :  { %364 = vmatpush.bf16.msrb.mxu3 %v534_v59 }
 0x2b6   :  { %365 = vmatpush.bf16.msrb.mxu3 %v533_v60 }
 0x30e   :  { %v168_v47 = vpop.xlane.xlu2 %167 }
 0x30f   :  { %550 = vrcp.f32 %v168_v47 }
 0x315   :  { %v551_v48 = vpop.eup %550 }
 0x316   :  { %v250_v49 = vpop.xlane.xlu0 %249  ;;  %v170_v50 = vmul.f32 %v551_v48, %v165_v40 }
 0x317   :  { %552 = vrcp.f32 %v250_v49 }
 0x318   :  { %v171_v51 = vpack.c.bf16 %v170_v50, %v170_v50 }
 0x31a   :  { %491 = vmatmul.msk.bf16.vlgmr.msra.gmra.mxu2 %vm158_vm3, %v171_v51 }
 0x31d   :  { %v553_v52 = vpop.eup %552 }
 0x31e   :  { %v252_v53 = vmul.f32 %v553_v52, %v247_v43 }
 0x320   :  { %v253_v54 = vpack.c.bf16 %v252_v53, %v252_v53 }
 0x322   :  { %493 = vmatmul.msk.bf16.vlgmr.msra.gmra.mxu3 %vm158_vm3, %v253_v54 }
 0x39d   :  { %v187_v61 = vpop.f32.mrf.mxu2 }
 0x39e   :  { %v192_v62 = vmin.f32 %v187_v61, 0.0  ;;  %vm191_vm4 = vcmp.gt.f32.partialorder %v187_v61, 0.0 }
 0x3a0   :  { %v193_v63 = vmul.f32 1.442695, %v192_v62 }
 0x3a2   :  { %554 = vpow2.f32 %v193_v63 }
 0x3a5   :  { %v189_v0 = vpop.f32.mrf.mxu2  ;;  %v274_v1 = vpop.f32.mrf.mxu3 }
 0x3a6   :  { %v279_v2 = vmin.f32 %v274_v1, 0.0  ;;  %vm278_vm6 = vcmp.gt.f32.partialorder %v274_v1, 0.0 }
 0x3a8   :  { %v555_v3 = vpop.eup %554  ;;  %v280_v4 = vmul.f32 1.442695, %v279_v2 }
 0x3a9   :  { %v492_v5 = vadd.f32 -1.0, %v555_v3 }
 0x3aa   :  { %556 = vpow2.f32 %v280_v4 }
 0x3ab   :  { %v196_v7 = vsel %vm191_vm4, %v187_v61, %v492_v5 }
 0x3ac   :  { %v197_v8 = vpack.c.bf16 %v196_v7, %v196_v7 }
 0x3ad   :  { %v276_v9 = vpop.f32.mrf.mxu3 }
 0x3ae   :  { %512 = vmatmul.msk.bf16.vlgmr.msrb.gmra.mxu2 %vm297_vm5, %v197_v8 }
 0x3b0   :  { %v557_v10 = vpop.eup %556 }
 0x3b1   :  { %v494_v11 = vadd.f32 -1.0, %v557_v10 }
 0x3b3   :  { %v283_v12 = vsel %vm278_vm6, %v274_v1, %v494_v11 }
 0x3b4   :  { %v284_v13 = vpack.c.bf16 %v283_v12, %v283_v12 }
 0x3b6   :  { %503 = vmatmul.msk.bf16.vlgmr.msrb.gmra.mxu0 %vm297_vm5, %v284_v13 }
 0x431   :  { %v338_v14 = vpop.f32.mrf.mxu2 }
 0x433   :  { %v310_v15 = vpop.f32.mrf.mxu0 }
 0x434   :  { %v339_v16 = vadd.f32 %v338_v14, %v310_v15 }
 0x436   :  { %v342_v17 = vpack.c.bf16 %v339_v16, %v339_v16 }
 0x438   :  { %521 = vmatmul.msk.bf16.vlgmr.msrb.gmra.mxu3 %vm297_vm5, %v342_v17  ;;  %v431_v18 = vsel %vm175_vm2, %v342_v17, 0 }
 0x439   :  { %v340_v19 = vpop.f32.mrf.mxu2  ;;  %440 = vmatpush.bf16.msrb.mxu1 %v431_v18 }
 0x43b   :  { %v312_v21 = vpop.f32.mrf.mxu0 }
 0x4bb   :  { %v367_v22 = vpop.f32.mrf.mxu3 }
 0x4bc   :  { %408 = vperm.xlu1 %544, %v367_v22   ;;  %372 = vrot.lane.b32.xlu0 %v367_v22, %s591_s0 }
 0x4c3   :  { %v369_v23 = vpop.f32.mrf.mxu3 }
 0x52e   :  { %v373_v24 = vpop.permute.xlu0 %372  ;;  %v409_v27 = vpop.permute.xlu1 %408 }
 0x52f   :  { %375 = vxpose.xlu0.b32.start.end [1/1] (short) (narrow) %v373_v24, 8 }
 0x596   :  { %545 = vset.pattern.permute.xlu0 %v590_v6 }
 0x5d3   :  { %v391_v25 = vpop.trf.xlu0 }
 0x5d4   :  { %v411_v26 = vperm.slane %v391_v25, 0 }
 0x5d6   :  { %v412_v28 = vadd.f32 %v411_v26, %v409_v27 }
 0x5d8   :  { %v413_v29 = vmax.f32 %v412_v28, 0.0 }
 0x5da   :  { %v414_v30 = vmul.f32 %v413_v29, %v656_v20 }
 0x5dc   :  { %v415_v31 = vsel %vm158_vm3, %v414_v30, -inf }
 0x5dd   :  { %416 = vmax.xlane.f32.xlu1 %v415_v31 }
 0x650   :  { %v417_v32 = vpop.xlane.xlu1 %416 }
 0x651   :  { %v418_v33 = vsub.f32 %v413_v29, %v417_v32 }
 0x653   :  { %v419_v34 = vmul.f32 1.442695, %v418_v33 }
 0x655   :  { %558 = vpow2.f32 %v419_v34 }
 0x65b   :  { %v559_v35 = vpop.eup %558 }
 0x65c   :  { %v421_v36 = vmul.f32 %v559_v35, %v656_v20 }
 0x65e   :  { %v422_v37 = vsel %vm158_vm3, %v421_v36, 0.0 }
 0x65f   :  { %423 = vadd.xlane.f32.xlu0 %v422_v37 }
 0x6d2   :  { %v424_v6 = vpop.xlane.xlu0 %423 }
 0x6d3   :  { %560 = vrcp.f32 %v424_v6 }
 0x6d9   :  { %v561_v38 = vpop.eup %560 }
 0x6da   :  { %v426_v39 = vmul.f32 %v561_v38, %v421_v36 }
 0x6dc   :  { %v427_v40 = vpack.c.bf16 %v426_v39, %v426_v39 }
 0x6de   :  { %522 = vmatmul.msk.bf16.vlgmr.msrb.gmra.mxu1 %vm158_vm3, %v427_v40 }
 0x75b   :  { %v442_v41 = vpop.f32.mrf.mxu1 }
 0x75c   :  { %v447_v42 = vmin.f32 %v442_v41, 0.0  ;;  %vm446_vm7 = vcmp.gt.f32.partialorder %v442_v41, 0.0 }
 0x75e   :  { %v448_v43 = vmul.f32 1.442695, %v447_v42 }
 0x760   :  { %562 = vpow2.f32 %v448_v43 }
 0x763   :  { %v444_v44 = vpop.f32.mrf.mxu1 }
 0x766   :  { %v563_v20 = vpop.eup %562 }
 0x767   :  { %v523_v45 = vadd.f32 -1.0, %v563_v20 }
 0x769   :  { %v451_v46 = vsel %vm446_vm7, %v442_v41, %v523_v45 }
 0x76a   :  { %452 = vst.msk [vmem:[#allocation2] sm:$0xff] %vm297_vm5, %v451_v46 }
 0x76b   :  { %463 = dma.vmem_to_hbm [thread:$0]  %s459_s5, 128, %s461_s24, [#allocation3]  }
 0x76c   :  { %588 = dma.done.wait [#allocation3], 128  }
 0x76d   :  { %589 = vsyncadd [#allocation3], 4294967168 }
 0x76e   :  { %468 = vsyncpa [#allocation3], 1 }

</bundles_post_ra>
